<compile_context>
chip_gen: v6e
topology: v6e:2x2x1
jax: 0.10.0
libtpu: 0.0.40
codegen_flags: <defaults>
</compile_context>

<pallas_src>
import numpy as np
import jax
import jax.numpy as jnp
from jax import lax
from jax.experimental import pallas as pl
from jax.experimental.pallas import tpu as pltpu

LANE = 128   # lane-dense feature width carried through the convs


def _round_up(x, m):
    return ((x + m - 1) // m) * m


def _elu(x):
    # f32 epilogue (EUP exp is a separate slot; keep VPU math in f32 for v5e).
    return jnp.where(x > 0, x, jnp.exp(x) - 1.0)


# --------------------------------------------------------------------------
# Pallas kernels
# --------------------------------------------------------------------------
def gcn_fused_kernel(a_ref, x_ref, w_ref, b_ref, o_ref):
    # ELU( A_hat @ (X @ W) + b ), fused: per (row_tile, k_tile) step compute the
    # k block's XW on the MXU and accumulate A_ik @ XW_k directly into o_ref
    # (f32, resident across k because the out index_map ignores k).
    k = pl.program_id(1)

    @pl.when(k == 0)
    def _():
        o_ref[...] = jnp.zeros_like(o_ref)

    xw = jnp.dot(x_ref[...], w_ref[...],
                 preferred_element_type=jnp.float32).astype(jnp.bfloat16)
    o_ref[...] += jnp.dot(a_ref[...], xw, preferred_element_type=jnp.float32)

    @pl.when(k == pl.num_programs(1) - 1)
    def _():
        o_ref[...] = _elu(o_ref[...] + b_ref[...])


def cluster_max_kernel(cid_ref, x_ref, o_ref):
    # pooled[c, f] = max_{n : cid[n] == c} x[n, f]   (empty clusters -> 0)
    # cid_ref lives in SMEM (scalar prefetch).  Running (tc, F) max + count are
    # fori_loop carries (stay in vregs) -> no (C, N, F) intermediate, no dense
    # mask DMA.
    i = pl.program_id(0)
    tc, f = o_ref.shape
    n = x_ref.shape[0]
    row_ids = lax.broadcasted_iota(jnp.int32, (tc, 1), 0) + i * tc

    def body(nidx, carry):
        mx, cnt = carry
        cid = cid_ref[nidx]                         # SMEM scalar read
        match = row_ids == cid                      # (tc, 1)
        xrow = x_ref[pl.ds(nidx, 1), :]             # (1, f)
        mx = jnp.where(match, jnp.maximum(mx, xrow), mx)
        cnt = cnt + match.astype(jnp.float32)
        return mx, cnt

    mx0 = jnp.full((tc, f), -jnp.inf, dtype=jnp.float32)
    cnt0 = jnp.zeros((tc, 1), dtype=jnp.float32)
    mx, cnt = lax.fori_loop(0, n, body, (mx0, cnt0))
    # TODO(synk): empty-slot fill value chosen as 0 to mirror PyG scatter('max')
    # dense fill; verify against the exact torch_scatter version if it matters.
    o_ref[...] = jnp.where(cnt > 0.5, mx, 0.0)


def mlp_kernel(x_ref, w1_ref, b1_ref, w2_ref, b2_ref, o_ref):
    # fc2( dropout( elu( fc1(x) ) ) ) -- dropout in eval mode == identity.
    h = jnp.dot(x_ref[...], w1_ref[...],
                preferred_element_type=jnp.float32) + b1_ref[...]
    h = _elu(h)
    o_ref[...] = jnp.dot(h.astype(w2_ref.dtype), w2_ref[...],
                         preferred_element_type=jnp.float32) + b2_ref[...]


# --------------------------------------------------------------------------
# Pallas wrappers
# --------------------------------------------------------------------------
def pallas_gcn_elu(a_hat_np, x, w_bf16, b_pad):
    """ELU(A_hat @ (X @ W) + b) with lane-dense (LANE-wide) padded output.

    a_hat_np: (N, N) numpy f32 normalized adjacency
    x:        (N, Fin) jnp f32 (Fin = in_channels for conv1, LANE otherwise)
    w_bf16:   (Fin, LANE) bf16 zero-padded weight; b_pad: (1, LANE) f32
    returns   (N, LANE) f32; padded columns are exactly 0.
    """
    n = a_hat_np.shape[0]
    fin = x.shape[1]
    if n <= 512:
        n_pad = _round_up(n, 128)
        row_tile = k_tile = n_pad          # single block: min launch overhead
    else:
        n_pad = _round_up(n, 512)
        row_tile, k_tile = 256, 512        # >=2 row blocks (v7x megacore), big k

    # Host-built adjacency goes over PCIe in bf16 (half the H2D bytes).
    a_np = np.zeros((n_pad, n_pad), dtype=np.float32)
    a_np[:n, :n] = a_hat_np
    a = jnp.asarray(a_np.astype(jnp.bfloat16))

    x_pad = jnp.zeros((n_pad, fin), dtype=jnp.bfloat16).at[:n].set(
        x.astype(jnp.bfloat16))

    out = pl.pallas_call(
        gcn_fused_kernel,
        out_shape=jax.ShapeDtypeStruct((n_pad, LANE), jnp.float32),
        grid=(n_pad // row_tile, n_pad // k_tile),
        in_specs=[pl.BlockSpec((row_tile, k_tile), lambda i, k: (i, k)),
                  pl.BlockSpec((k_tile, fin), lambda i, k: (k, 0)),
                  pl.BlockSpec((fin, LANE), lambda i, k: (0, 0)),
                  pl.BlockSpec((1, LANE), lambda i, k: (0, 0))],
        out_specs=pl.BlockSpec((row_tile, LANE), lambda i, k: (i, 0)),
        compiler_params=pltpu.CompilerParams(
            dimension_semantics=("parallel", "arbitrary")),
    )(a, x_pad, w_bf16, b_pad)
    return out[:n]


def pallas_cluster_max(cluster_np, n_clusters, x):
    """cluster_np: (N,) int cluster ids; x: (N, F) jnp f32 -> (n_clusters, F) f32."""
    n, f = x.shape
    n_pad = _round_up(n, 8)
    tc = min(128, _round_up(n_clusters, 8))
    c_pad = _round_up(n_clusters, tc)

    cid = np.full((n_pad,), -1, dtype=np.int32)       # padded nodes never match
    cid[:n] = cluster_np.astype(np.int32)
    cid = jnp.asarray(cid)

    if n_pad != n:
        x = jnp.zeros((n_pad, f), dtype=x.dtype).at[:n].set(x)

    out = pl.pallas_call(
        cluster_max_kernel,
        out_shape=jax.ShapeDtypeStruct((c_pad, f), jnp.float32),
        grid_spec=pltpu.PrefetchScalarGridSpec(
            num_scalar_prefetch=1,
            grid=(c_pad // tc,),
            in_specs=[pl.BlockSpec((n_pad, f), lambda i, cid_ref: (0, 0))],
            out_specs=pl.BlockSpec((tc, f), lambda i, cid_ref: (i, 0))),
        compiler_params=pltpu.CompilerParams(
            dimension_semantics=("parallel",)),
    )(cid, x)
    return out[:n_clusters]


def pallas_mlp(x, params, out_dim):
    """fc2(elu(fc1(x))); fc2 output padded to LANE (unmasked stores), sliced back."""
    m, k = x.shape
    h = params["fc1_w"].shape[1]
    m_pad = _round_up(m, 8)
    x_pad = jnp.zeros((m_pad, k), dtype=jnp.bfloat16).at[:m].set(
        x.astype(jnp.bfloat16))
    out = pl.pallas_call(
        mlp_kernel,
        out_shape=jax.ShapeDtypeStruct((m_pad, LANE), jnp.float32),
        grid=(1,),
        in_specs=[pl.BlockSpec((m_pad, k), lambda i: (0, 0)),
                  pl.BlockSpec((k, h), lambda i: (0, 0)),
                  pl.BlockSpec((1, h), lambda i: (0, 0)),
                  pl.BlockSpec((h, LANE), lambda i: (0, 0)),
                  pl.BlockSpec((1, LANE), lambda i: (0, 0))],
        out_specs=pl.BlockSpec((m_pad, LANE), lambda i: (0, 0)),
        compiler_params=pltpu.CompilerParams(dimension_semantics=("arbitrary",)),
    )(x_pad, params["fc1_w"], params["fc1_b"], params["fc2_w"], params["fc2_b"])
    return out[:m, :out_dim]


# --------------------------------------------------------------------------
# Graph-structure glue (numpy; data-dependent bookkeeping, not hot compute)
# --------------------------------------------------------------------------
def gcn_norm_adj(edge_index, n):
    """Dense D^{-1/2} (A + I) D^{-1/2} as used by GCNConv."""
    a = np.zeros((n, n), dtype=np.float32)
    if edge_index.size:
        a[edge_index[1], edge_index[0]] = 1.0        # message src -> dst
    a = a + np.eye(n, dtype=np.float32)
    deg = a.sum(axis=1)
    dinv = 1.0 / np.sqrt(np.maximum(deg, 1.0))
    return (dinv[:, None] * a) * dinv[None, :]


def voxel_cluster(pos, batch, size):
    # TODO(synk): bit-packed key assumes non-negative cells and <2^20 per axis.
    cell = np.floor(pos / size).astype(np.int64)
    key = batch.astype(np.int64) * (1 << 40) + cell[:, 0] * (1 << 20) + cell[:, 1]
    _, inv = np.unique(key, return_inverse=True)     # consecutive relabel
    return inv


def graph_max_pool(cluster, x, pos, batch, edge_index):
    """PyG max_pool: max-pool x, mean-pool pos, coarsen edges, keep batch."""
    n = pos.shape[0]
    n_clusters = int(cluster.max()) + 1
    x_pooled = pallas_cluster_max(cluster, n_clusters, x)        # Pallas hot path
    counts = np.bincount(cluster, minlength=n_clusters).astype(np.float32)
    pos_pooled = np.zeros((n_clusters, pos.shape[1]), dtype=np.float32)
    np.add.at(pos_pooled, cluster, pos.astype(np.float32))
    pos_pooled /= counts[:, None]
    batch_pooled = np.zeros(n_clusters, dtype=np.int64)
    batch_pooled[cluster] = batch
    src, dst = cluster[edge_index[0]], cluster[edge_index[1]]
    keep = src != dst
    if keep.any():
        e = np.unique(np.stack([src[keep], dst[keep]], axis=1), axis=0).T
    else:
        e = np.zeros((2, 0), dtype=np.int64)
    return x_pooled, pos_pooled, batch_pooled, e


def max_pool_x_fixed(pos, batch, x, voxel_size, size):
    """PyG max_pool_x(cluster, x, batch, size=size): (B*size, F) dense max-pool."""
    cell = np.floor(pos / voxel_size).astype(np.int64)
    ncols = int(cell[:, 1].max()) + 1
    vox = cell[:, 0] * ncols + cell[:, 1]
    assert int(vox.max()) < size
    cluster = batch.astype(np.int64) * size + vox
    c_total = (int(batch.max()) + 1) * size
    return pallas_cluster_max(cluster, c_total, x)               # Pallas hot path


# --------------------------------------------------------------------------
# CombNet forward
# --------------------------------------------------------------------------
def combnet_forward(x, pos, batch, edge_index, params, out_features):
    # conv1 + ELU (true width 32, lane-padded to 128; padded columns stay 0)
    a1 = gcn_norm_adj(edge_index, x.shape[0])
    x = pallas_gcn_elu(a1, x, params["w1"], params["b1"])
    # voxel_grid(size=2) + max_pool
    cluster = voxel_cluster(pos, batch, 2.0)
    x, pos, batch, edge_index = graph_max_pool(cluster, x, pos, batch, edge_index)
    # conv2 + ELU (true width 64)
    a2 = gcn_norm_adj(edge_index, x.shape[0])
    x = pallas_gcn_elu(a2, x, params["w2"], params["b2"])
    # voxel_grid(size=4) + max_pool
    cluster = voxel_cluster(pos, batch, 4.0)
    x, pos, batch, edge_index = graph_max_pool(cluster, x, pos, batch, edge_index)
    # conv3 + ELU (true width 64)
    a3 = gcn_norm_adj(edge_index, x.shape[0])
    x = pallas_gcn_elu(a3, x, params["w3"], params["b3"])
    # voxel_grid(size=8) + max_pool_x(size=144)
    x = max_pool_x_fixed(pos, batch, x, 8.0, 144)
    # drop the lane padding back to conv3's true width (64) and flatten:
    # x.view(-1, fc1.weight.size(1))
    x = x[:, :64].reshape(-1, out_features * 64)
    # fc1 -> ELU -> dropout(eval) -> fc2   (fused Pallas kernel)
    return pallas_mlp(x, params, out_features)


def init_params(key, in_channels, out_features):
    # All padding / reshaping / bf16 casting is done ONCE here (hoisted out of
    # the per-forward hot path).
    ks = jax.random.split(key, 5)

    def lin(k, fin, fout):
        w = (0.1 * jax.random.normal(k, (fin, fout))).astype(jnp.float32)
        b = jnp.zeros((fout,), dtype=jnp.float32)
        return w, b

    def pad_w(w, fin_pad, fout_pad):
        wp = jnp.zeros((fin_pad, fout_pad), jnp.float32)
        wp = wp.at[:w.shape[0], :w.shape[1]].set(w)
        return wp.astype(jnp.bfloat16)

    def pad_b(b, fout_pad):
        return jnp.zeros((1, fout_pad), jnp.float32).at[0, :b.shape[0]].set(b)

    w1, b1 = lin(ks[0], in_channels, 32)          # GCNConv(in, 32)
    w2, b2 = lin(ks[1], 32, 64)                   # GCNConv(32, 64)
    w3, b3 = lin(ks[2], 64, 64)                   # GCNConv(64, 64)
    fc1_w, fc1_b = lin(ks[3], out_features * 64, 128)
    fc2_w, fc2_b = lin(ks[4], 128, out_features)
    return dict(
        w1=pad_w(w1, in_channels, LANE), b1=pad_b(b1, LANE),
        w2=pad_w(w2, LANE, LANE),        b2=pad_b(b2, LANE),
        w3=pad_w(w3, LANE, LANE),        b3=pad_b(b3, LANE),
        fc1_w=fc1_w.astype(jnp.bfloat16), fc1_b=pad_b(fc1_b, LANE),
        fc2_w=pad_w(fc2_w, LANE, LANE),   fc2_b=pad_b(fc2_b, LANE),
    )


def build_grid_graph(batch_size, side, in_channels, key):
    xs, ys = np.meshgrid(np.arange(side), np.arange(side), indexing="ij")
    pos1 = np.stack([xs.ravel(), ys.ravel()], axis=1).astype(np.float32)
    pos = np.concatenate([pos1] * batch_size, axis=0)
    batch = np.repeat(np.arange(batch_size), side * side)

    def nid(b, i, j):
        return b * side * side + i * side + j

    edges = []
    for b in range(batch_size):
        for i in range(side):
            for j in range(side):
                if i + 1 < side:
                    edges.append((nid(b, i, j), nid(b, i + 1, j)))
                if j + 1 < side:
                    edges.append((nid(b, i, j), nid(b, i, j + 1)))
    e = np.asarray(edges, dtype=np.int64).T
    edge_index = np.concatenate([e, e[::-1]], axis=1)           # undirected
    x = jax.random.normal(key, (pos.shape[0], in_channels)).astype(jnp.float32)
    return x, pos, batch, edge_index


if __name__ == "__main__":
    out_features = 16
    in_channels = 4
    batch_size = 2
    side = 8                       # 8x8 grid per example -> 128 nodes total

    key = jax.random.PRNGKey(0)
    k_data, k_params = jax.random.split(key)
    x, pos, batch, edge_index = build_grid_graph(batch_size, side, in_channels, k_data)
    params = init_params(k_params, in_channels, out_features)

    out = combnet_forward(x, pos, batch, edge_index, params, out_features)
    out = jax.block_until_ready(out)

    expected_rows = (batch_size * 144 * 64) // (out_features * 64)
    assert out.shape == (expected_rows, out_features), out.shape
    assert out.dtype == jnp.float32
    assert bool(jnp.all(jnp.isfinite(out)))
    print("KERNEL_OK")
</pallas_src>

<mosaic_0001>
module attributes {stable_mosaic.version = 11 : i64} {
  func.func @gcn_fused_kernel(%arg0: i32, %arg1: i32, %arg2: memref<128x128xbf16, #tpu.memory_space<vmem>>, %arg3: memref<128x4xbf16, #tpu.memory_space<vmem>>, %arg4: memref<4x128xbf16, #tpu.memory_space<vmem>>, %arg5: memref<1x128xf32, #tpu.memory_space<vmem>>, %arg6: memref<128x128xf32, #tpu.memory_space<vmem>>) attributes {dimension_semantics = [#tpu.dimension_semantics<parallel>, #tpu.dimension_semantics<arbitrary>], iteration_bounds = array<i64: 1, 1>, scalar_prefetch = 0 : i64, scratch_operands = 0 : i64, tpu.core_type = #tpu.core_type<tc>, window_params = [{transform_indices = @transform_0, window_bounds = array<i64: 128, 128>}, {transform_indices = @transform_1, window_bounds = array<i64: 128, 4>}, {pipeline_mode = #tpu.pipeline_mode<synchronous>, transform_indices = @transform_2, window_bounds = array<i64: 4, 128>}, {pipeline_mode = #tpu.pipeline_mode<synchronous>, transform_indices = @transform_3, window_bounds = array<i64: 1, 128>}, {transform_indices = @transform_4, window_bounds = array<i64: 128, 128>}]} {
    %c0_i32 = arith.constant 0 : i32
    %0 = arith.cmpi eq, %arg1, %c0_i32 : i32
    %1 = arith.extui %0 : i1 to i32
    %c0_i32_0 = arith.constant 0 : i32
    %2 = arith.cmpi ne, %1, %c0_i32_0 : i32
    scf.if %2 {
      %cst_13 = arith.constant 0.000000e+00 : f32
      %15 = vector.broadcast %cst_13 : f32 to vector<128x128xf32>
      %c0_14 = arith.constant 0 : index
      %c0_15 = arith.constant 0 : index
      %16 = vector.load %arg6[%c0_14, %c0_15] : memref<128x128xf32, #tpu.memory_space<vmem>>, vector<128x128xf32>
      tpu.vector_store %arg6[%c0_14, %c0_15], %15 {strides = array<i32>} : memref<128x128xf32, #tpu.memory_space<vmem>>, vector<128x128xf32>,
    } else {
    }
    %c0 = arith.constant 0 : index
    %c0_1 = arith.constant 0 : index
    %3 = vector.load %arg3[%c0, %c0_1] : memref<128x4xbf16, #tpu.memory_space<vmem>>, vector<128x4xbf16>
    %c0_2 = arith.constant 0 : index
    %c0_3 = arith.constant 0 : index
    %4 = vector.load %arg4[%c0_2, %c0_3] : memref<4x128xbf16, #tpu.memory_space<vmem>>, vector<4x128xbf16>
    %cst = arith.constant dense<0.000000e+00> : vector<128x128xf32>
    %5 = tpu.matmul %3, %4, %cst {dimension_numbers = #tpu.dot_dimension_numbers<[1], [0], [0], [1], [0, 0, 1, 1], [], []>} : vector<128x4xbf16>, vector<4x128xbf16>, vector<128x128xf32> -> vector<128x128xf32>
    %6 = arith.truncf %5 : vector<128x128xf32> to vector<128x128xbf16>
    %c0_4 = arith.constant 0 : index
    %c0_5 = arith.constant 0 : index
    %7 = vector.load %arg6[%c0_4, %c0_5] : memref<128x128xf32, #tpu.memory_space<vmem>>, vector<128x128xf32>
    %c0_6 = arith.constant 0 : index
    %c0_7 = arith.constant 0 : index
    %8 = vector.load %arg2[%c0_6, %c0_7] : memref<128x128xbf16, #tpu.memory_space<vmem>>, vector<128x128xbf16>
    %cst_8 = arith.constant dense<0.000000e+00> : vector<128x128xf32>
    %9 = tpu.matmul %8, %6, %cst_8 {dimension_numbers = #tpu.dot_dimension_numbers<[1], [0], [0], [1], [0, 0, 1, 1], [], []>} : vector<128x128xbf16>, vector<128x128xbf16>, vector<128x128xf32> -> vector<128x128xf32>
    %10 = arith.addf %7, %9 : vector<128x128xf32>
    %c0_9 = arith.constant 0 : index
    %c0_10 = arith.constant 0 : index
    %11 = vector.load %arg6[%c0_9, %c0_10] : memref<128x128xf32, #tpu.memory_space<vmem>>, vector<128x128xf32>
    tpu.vector_store %arg6[%c0_9, %c0_10], %10 {strides = array<i32>} : memref<128x128xf32, #tpu.memory_space<vmem>>, vector<128x128xf32>,
    %c0_i32_11 = arith.constant 0 : i32
    %12 = arith.cmpi eq, %arg1, %c0_i32_11 : i32
    %13 = arith.extui %12 : i1 to i32
    %c0_i32_12 = arith.constant 0 : i32
    %14 = arith.cmpi ne, %13, %c0_i32_12 : i32
    scf.if %14 {
      %c0_13 = arith.constant 0 : index
      %c0_14 = arith.constant 0 : index
      %15 = vector.load %arg6[%c0_13, %c0_14] : memref<128x128xf32, #tpu.memory_space<vmem>>, vector<128x128xf32>
      %c0_15 = arith.constant 0 : index
      %c0_16 = arith.constant 0 : index
      %16 = vector.load %arg5[%c0_15, %c0_16] : memref<1x128xf32, #tpu.memory_space<vmem>>, vector<1x128xf32>
      %17 = vector.broadcast %16 : vector<1x128xf32> to vector<128x128xf32>
      %18 = arith.addf %15, %17 : vector<128x128xf32>
      %cst_17 = arith.constant 0.000000e+00 : f32
      %19 = vector.broadcast %cst_17 : f32 to vector<128x128xf32>
      %20 = arith.cmpf ogt, %18, %19 : vector<128x128xf32>
      %21 = math.exp %18 : vector<128x128xf32>
      %cst_18 = arith.constant 1.000000e+00 : f32
      %22 = vector.broadcast %cst_18 : f32 to vector<128x128xf32>
      %23 = arith.subf %21, %22 : vector<128x128xf32>
      %24 = arith.select %20, %18, %23 : vector<128x128xi1>, vector<128x128xf32>
      %c0_19 = arith.constant 0 : index
      %c0_20 = arith.constant 0 : index
      %25 = vector.load %arg6[%c0_19, %c0_20] : memref<128x128xf32, #tpu.memory_space<vmem>>, vector<128x128xf32>
      tpu.vector_store %arg6[%c0_19, %c0_20], %24 {strides = array<i32>} : memref<128x128xf32, #tpu.memory_space<vmem>>, vector<128x128xf32>,
    } else {
    }
    return
  }
  func.func @transform_0(%arg0: i32, %arg1: i32) -> (i32, i32) {
    %c0_i32 = arith.constant 0 : i32
    return %arg0, %arg1 : i32, i32
  }
  func.func @transform_1(%arg0: i32, %arg1: i32) -> (i32, i32) {
    %c0_i32 = arith.constant 0 : i32
    %c0_i32_0 = arith.constant 0 : i32
    return %arg1, %c0_i32 : i32, i32
  }
  func.func @transform_2(%arg0: i32, %arg1: i32) -> (i32, i32) {
    %c0_i32 = arith.constant 0 : i32
    %c0_i32_0 = arith.constant 0 : i32
    %c0_i32_1 = arith.constant 0 : i32
    return %c0_i32, %c0_i32_0 : i32, i32
  }
  func.func @transform_3(%arg0: i32, %arg1: i32) -> (i32, i32) {
    %c0_i32 = arith.constant 0 : i32
    %c0_i32_0 = arith.constant 0 : i32
    %c0_i32_1 = arith.constant 0 : i32
    return %c0_i32, %c0_i32_0 : i32, i32
  }
  func.func @transform_4(%arg0: i32, %arg1: i32) -> (i32, i32) {
    %c0_i32 = arith.constant 0 : i32
    %c0_i32_0 = arith.constant 0 : i32
    return %arg0, %c0_i32 : i32, i32
  }
}

</mosaic_0001>

<bundles_post_ra>
// kernel: tpu_custom_call.1
= control target key start
LH: loop header
LB: loop body
LE: loop exit
PB: predicated region body
PF: predicated region fallthrough
CT: control target
= control target key end

     0   :  { %vm121_vm0 = vcmask 1041408   ;;  %vm96_vm1 = vcmask 31744   ;;  %s986_s0 = inlined_call_operand.vmem [shape: bf16[128,128], index: 0, kind: input, shape index: {}]   ;;  %s987_s1 = inlined_call_operand.vmem [shape: bf16[128,4], index: 1, kind: input, shape index: {}]   ;;  %s988_s2 = inlined_call_operand.vmem [shape: bf16[4,128], index: 2, kind: input, shape index: {}]   ;;  %s989_s3 = inlined_call_operand.vmem [shape: f32[1,128], index: 3, kind: input, shape index: {}]   ;;  %s990_s4 = inlined_call_operand.hbm [shape: f32[128,128], index: 4, kind: output, shape index: {}]  }
   0x1   :  { %v55_v0 = vld [vmem:[%s988_s2] sm:$0x3]  ;;  %v731_v3 = vld [vmem:[%s987_s1 + $0x8] sm:$0xff]   ;;  %v732_v4 = vld [vmem:[%s987_s1 + $0x10] sm:$0xff]  }
   0x2   :  { %v730_v1 = vld [vmem:[%s987_s1] sm:$0xff]   ;;  %725 = vmatprep.subr.msk.bf16.mxu0 %vm121_vm0, %v55_v0  ;;  %v123_v2 = vsel %vm121_vm0, %v55_v0, 0  ;;  %v733_v5 = vld [vmem:[%s987_s1 + $0x18] sm:$0xff]  }
   0x3   :  { %660 = vmatpush3.bf16.msra.mxu0 %v123_v2  ;;  %661 = vmatprep.mubr.msk.bf16.mxu0 %vm96_vm1, %v730_v1  ;;  %v734_v6 = vld [vmem:[%s987_s1 + $0x20] sm:$0xff]  }
   0x6   :  { %662 = vmatmul.mubr.msk.bf16.vlgmr.msra.gmra.mxu0 %vm96_vm1, %v731_v3 }
   0x7   :  { %665 = vmatprep.mubr.msk.bf16.mxu0 %vm96_vm1, %v732_v4 }
   0xe   :  { %666 = vmatmul.mubr.msk.bf16.gmra.mxu0 %vm96_vm1, %v733_v5 }
   0xf   :  { %669 = vmatprep.mubr.msk.bf16.mxu0 %vm96_vm1, %v734_v6 }
  0x10   :  { %9 = vsyncpa [#allocation3], 0  ;;  %v735_v7 = vld [vmem:[%s987_s1 + $0x28] sm:$0xff]   ;;  %v736_v8 = vld [vmem:[%s987_s1 + $0x30] sm:$0xff]  }
  0x11   :  { %v737_v9 = vld [vmem:[%s987_s1 + $0x38] sm:$0xff]   ;;  %v738_v10 = vld [vmem:[%s986_s0] sm:$0xff]   ;;  %v739_v11 = vld [vmem:[%s986_s0 + $0x10] sm:$0xff]  }
  0x12   :  { %697 = vmatprep.mubr.bf16.mxu1 %v739_v11  ;;  %v740_v36 = vld [vmem:[%s986_s0 + $0x8] sm:$0xff]   ;;  %v741_v37 = vld [vmem:[%s986_s0 + $0x18] sm:$0xff]   ;;  %v742_v38 = vld [vmem:[%s986_s0 + $0x20] sm:$0xff]  }
  0x13   :  { %v743_v39 = vld [vmem:[%s986_s0 + $0x28] sm:$0xff]   ;;  %v744_v40 = vld [vmem:[%s986_s0 + $0x30] sm:$0xff]   ;;  %v745_v41 = vld [vmem:[%s986_s0 + $0x38] sm:$0xff]   ;;  %s800_s0 = smov [#allocation2]  }
  0x14   :  { %v890_v43 = vld [vmem:[%s989_s3] ss:$0 sm:$0xff]  ;;  %s582_s3 = sshll.u32 %s800_s0, 4  ;;  %s583_s3 = int_to_ptr.vmem [resolvable:$true] %s582_s3 }
  0x15   :  { %s778_s2 = scalar_lea.vmem %s583_s3, 2048  ;;  %p783_p1 = scmp.lt.s32.totalorder %s583_s3, %s583_s3 }
  0x16   :  { %670 = vmatmul.mubr.msk.bf16.gmra.mxu0 %vm96_vm1, %v735_v7  ;;  %p779_p0 = scmp.ne.s32.totalorder %s583_s3, %s778_s2  ;;  %p784_p2 = scmp.lt.s32.totalorder %s778_s2, %s778_s2 }
  0x17   :  { %673 = vmatprep.mubr.msk.bf16.mxu0 %vm96_vm1, %v736_v8 }
  0x18   :  { %p785_p3 = por %p784_p2, %p783_p1 }
  0x1a   :  { %p786_p4 = pnand %p785_p3, %p779_p0 }
  0x1e   :  { %674 = vmatmul.mubr.msk.bf16.gmra.mxu0 %vm96_vm1, %v737_v9 }
  0x1f   :  { %693 = vmatprep.mubr.bf16.mxu0 %v738_v10 }
  0xc6   :  { %v663_v12 = vpop.f32.mrf.mxu0 }
  0xc8   :  { %v159_v13 = vpop.f32.mrf.mxu0 }
  0xca   :  { %v664_v14 = vpop.f32.mrf.mxu0 }
  0xcb   :  { %v223_v34 = vpack.c.bf16 %v664_v14, %v663_v12 }
  0xcc   :  { %v162_v15 = vpop.f32.mrf.mxu0 }
  0xcd   :  { %v222_v35 = vpack.c.bf16 %v162_v15, %v159_v13 }
  0xce   :  { %v667_v16 = vpop.f32.mrf.mxu0 }
  0xd0   :  { %v175_v17 = vpop.f32.mrf.mxu0 }
  0xd2   :  { %v668_v18 = vpop.f32.mrf.mxu0 }
  0xd3   :  { %v225_v32 = vpack.c.bf16 %v668_v18, %v667_v16 }
  0xd4   :  { %v178_v19 = vpop.f32.mrf.mxu0 }
  0xd5   :  { %v224_v33 = vpack.c.bf16 %v178_v19, %v175_v17 }
  0xd6   :  { %v671_v20 = vpop.f32.mrf.mxu0 }
  0xd8   :  { %v191_v21 = vpop.f32.mrf.mxu0 }
  0xda   :  { %v672_v22 = vpop.f32.mrf.mxu0 }
  0xdb   :  { %v227_v30 = vpack.c.bf16 %v672_v22, %v671_v20 }
  0xdc   :  { %v194_v23 = vpop.f32.mrf.mxu0 }
  0xdd   :  { %v226_v31 = vpack.c.bf16 %v194_v23, %v191_v21 }
  0xde   :  { %v675_v24 = vpop.f32.mrf.mxu0 }
  0xe0   :  { %v207_v25 = vpop.f32.mrf.mxu0 }
  0xe2   :  { %v676_v26 = vpop.f32.mrf.mxu0 }
  0xe3   :  { %v229_v27 = vpack.c.bf16 %v676_v26, %v675_v24 }
  0xe4   :  { %v210_v28 = vpop.f32.mrf.mxu0 }
  0xe5   :  { %v228_v29 = vpack.c.bf16 %v210_v28, %v207_v25  ;;  %677 = vmatprep.subr.bf16.mxu0 %v229_v27  ;;  %709 = vmatprep.subr.bf16.mxu1 %v229_v27 }
  0xe6   :  { %678 = vmatpush3.bf16.msra.mxu0 %v229_v27  ;;  %717 = vmatpush3.bf16.msra.mxu1 %v229_v27 }
  0xe7   :  { %679 = vmatprep.subr.bf16.mxu0 %v228_v29  ;;  %710 = vmatprep.subr.bf16.mxu1 %v228_v29 }
  0xea   :  { %680 = vmatpush3.bf16.msra.mxu0 %v228_v29  ;;  %718 = vmatpush3.bf16.msra.mxu1 %v228_v29 }
  0xeb   :  { %681 = vmatprep.subr.bf16.mxu0 %v227_v30  ;;  %711 = vmatprep.subr.bf16.mxu1 %v227_v30 }
  0xee   :  { %682 = vmatpush3.bf16.msra.mxu0 %v227_v30  ;;  %719 = vmatpush3.bf16.msra.mxu1 %v227_v30 }
  0xef   :  { %683 = vmatprep.subr.bf16.mxu0 %v226_v31  ;;  %712 = vmatprep.subr.bf16.mxu1 %v226_v31 }
  0xf2   :  { %684 = vmatpush3.bf16.msra.mxu0 %v226_v31  ;;  %720 = vmatpush3.bf16.msra.mxu1 %v226_v31 }
  0xf3   :  { %685 = vmatprep.subr.bf16.mxu0 %v225_v32  ;;  %713 = vmatprep.subr.bf16.mxu1 %v225_v32 }
  0xf6   :  { %686 = vmatpush3.bf16.msra.mxu0 %v225_v32  ;;  %721 = vmatpush3.bf16.msra.mxu1 %v225_v32 }
  0xf7   :  { %687 = vmatprep.subr.bf16.mxu0 %v224_v33  ;;  %714 = vmatprep.subr.bf16.mxu1 %v224_v33 }
  0xfa   :  { %688 = vmatpush3.bf16.msra.mxu0 %v224_v33  ;;  %722 = vmatpush3.bf16.msra.mxu1 %v224_v33 }
  0xfb   :  { %689 = vmatprep.subr.bf16.mxu0 %v223_v34  ;;  %715 = vmatprep.subr.bf16.mxu1 %v223_v34 }
  0xfe   :  { %690 = vmatpush3.bf16.msra.mxu0 %v223_v34  ;;  %723 = vmatpush3.bf16.msra.mxu1 %v223_v34 }
  0xff   :  { %691 = vmatprep.subr.bf16.mxu0 %v222_v35  ;;  %716 = vmatprep.subr.bf16.mxu1 %v222_v35 }
 0x102   :  { %692 = vmatpush3.bf16.msra.mxu0 %v222_v35  ;;  %724 = vmatpush3.bf16.msra.mxu1 %v222_v35 }
 0x105   :  { %694 = vmatmul.mubr.bf16.vlgmr.msra.gmra.mxu0 %v740_v36  ;;  %698 = vmatmul.mubr.bf16.vlgmr.msra.gmra.mxu1 %v741_v37 }
 0x106   :  { %701 = vmatprep.mubr.bf16.mxu1 %v742_v38 }
 0x10d   :  { %702 = vmatmul.mubr.bf16.gmra.mxu1 %v743_v39 }
 0x10e   :  { %705 = vmatprep.mubr.bf16.mxu1 %v744_v40 }
 0x115   :  { %706 = vmatmul.mubr.bf16.gmra.mxu1 %v745_v41 }
 0x1c5   :  { %v695_v42 = vpop.f32.mrf.mxu0  ;;  %v699_v44 = vpop.f32.mrf.mxu1 }
 0x1c6   :  { %v467_v47 = vadd.f32 %v695_v42, %v890_v43  ;;  %v894_v48 = vadd.f32 %v699_v44, %v890_v43 }
 0x1c7   :  { %v344_v45 = vpop.f32.mrf.mxu0  ;;  %v360_v46 = vpop.f32.mrf.mxu1 }
 0x1c8   :  { %v501_v51 = vmul.f32 1.442695, %v467_v47  ;;  %v509_v52 = vmul.f32 1.442695, %v894_v48  ;;  %v898_v53 = vadd.f32 %v890_v43, %v344_v45  ;;  %v901_v54 = vadd.f32 %v890_v43, %v360_v46 }
 0x1c9   :  { %v696_v49 = vpop.f32.mrf.mxu0  ;;  %v700_v50 = vpop.f32.mrf.mxu1  ;;  %vm483_vm2 = vcmp.gt.f32.partialorder %v467_v47, 0.0  ;;  %vm487_vm3 = vcmp.gt.f32.partialorder %v894_v48, 0.0 }
 0x1ca   :  { %746 = vpow2.f32 %v501_v51  ;;  %v497_v57 = vmul.f32 1.442695, %v898_v53  ;;  %v505_v59 = vmul.f32 1.442695, %v901_v54  ;;  %v906_v60 = vadd.f32 %v696_v49, %v890_v43 }
 0x1cb   :  { %v347_v55 = vpop.f32.mrf.mxu0  ;;  %v363_v56 = vpop.f32.mrf.mxu1  ;;  %748 = vpow2.f32 %v509_v52  ;;  %v909_v61 = vadd.f32 %v700_v50, %v890_v43  ;;  %vm481_vm4 = vcmp.gt.f32.partialorder %v898_v53, 0.0  ;;  %vm485_vm5 = vcmp.gt.f32.partialorder %v901_v54, 0.0 }
 0x1cc   :  { %v912_v62 = vadd.f32 %v890_v43, %v347_v55  ;;  %750 = vpow2.f32 %v497_v57  ;;  %v915_v63 = vadd.f32 %v890_v43, %v363_v56  ;;  %v503_v1 = vmul.f32 1.442695, %v906_v60 }
 0x1cd   :  { %v703_v58 = vpop.f32.mrf.mxu1  ;;  %752 = vpow2.f32 %v505_v59  ;;  %v511_v2 = vmul.f32 1.442695, %v909_v61  ;;  %vm484_vm6 = vcmp.gt.f32.partialorder %v906_v60, 0.0  ;;  %vm488_vm7 = vcmp.gt.f32.partialorder %v909_v61, 0.0 }
 0x1ce   :  { %v499_v3 = vmul.f32 1.442695, %v912_v62  ;;  %754 = vpow2.f32 %v503_v1  ;;  %v507_v5 = vmul.f32 1.442695, %v915_v63  ;;  %v922_v6 = vadd.f32 %v703_v58, %v890_v43 }
 0x1cf   :  { %v376_v0 = vpop.f32.mrf.mxu1  ;;  %756 = vpow2.f32 %v511_v2  ;;  %vm482_vm8 = vcmp.gt.f32.partialorder %v912_v62, 0.0  ;;  %vm486_vm9 = vcmp.gt.f32.partialorder %v915_v63, 0.0 }
 0x1d0   :  { %758 = vpow2.f32 %v499_v3  ;;  %v517_v8 = vmul.f32 1.442695, %v922_v6  ;;  %v926_v9 = vadd.f32 %v890_v43, %v376_v0  ;;  %vm491_vm10 = vcmp.gt.f32.partialorder %v922_v6, 0.0 }
 0x1d1   :  { %v704_v4 = vpop.f32.mrf.mxu1  ;;  %760 = vpow2.f32 %v507_v5 }
 0x1d2   :  { %v929_v10 = vadd.f32 %v704_v4, %v890_v43  ;;  %762 = vpow2.f32 %v517_v8  ;;  %v513_v12 = vmul.f32 1.442695, %v926_v9  ;;  %vm489_vm11 = vcmp.gt.f32.partialorder %v926_v9, 0.0 }
 0x1d3   :  { %v379_v7 = vpop.f32.mrf.mxu1 }
 0x1d4   :  { %v519_v13 = vmul.f32 1.442695, %v929_v10  ;;  %v934_v14 = vadd.f32 %v890_v43, %v379_v7  ;;  %764 = vpow2.f32 %v513_v12  ;;  %vm492_vm12 = vcmp.gt.f32.partialorder %v929_v10, 0.0 }
 0x1d5   :  { %v707_v11 = vpop.f32.mrf.mxu1 }
 0x1d6   :  { %v937_v16 = vadd.f32 %v707_v11, %v890_v43  ;;  %766 = vpow2.f32 %v519_v13  ;;  %v515_v18 = vmul.f32 1.442695, %v934_v14  ;;  %vm490_vm13 = vcmp.gt.f32.partialorder %v934_v14, 0.0 }
 0x1d7   :  { %v392_v15 = vpop.f32.mrf.mxu1  ;;  %v747_v17 = vpop.eup %746 }
 0x1d8   :  { %v749_v20 = vpop.eup %748  ;;  %v620_v21 = vadd.f32 -1.0, %v747_v17  ;;  %v525_v22 = vmul.f32 1.442695, %v937_v16  ;;  %v942_v23 = vadd.f32 %v890_v43, %v392_v15  ;;  %768 = vpow2.f32 %v515_v18 }
 0x1d9   :  { %v708_v19 = vpop.f32.mrf.mxu1  ;;  %v624_v24 = vadd.f32 -1.0, %v749_v20  ;;  %v751_v26 = vpop.eup %750  ;;  %vm495_vm14 = vcmp.gt.f32.partialorder %v937_v16, 0.0 }
 0x1da   :  { %v547_v27 = vsel %vm483_vm2, %v467_v47, %v620_v21  ;;  %770 = vpow2.f32 %v525_v22  ;;  %v521_v28 = vmul.f32 1.442695, %v942_v23  ;;  %v753_v29 = vpop.eup %752  ;;  %v618_v31 = vadd.f32 -1.0, %v751_v26 }
 0x1db   :  { %v395_v25 = vpop.f32.mrf.mxu1  ;;  %563 = vst [vmem:[#allocation2 + $0x10] sm:$0xff] %v547_v27  ;;  %v551_v30 = vsel %vm487_vm3, %v894_v48, %v624_v24  ;;  %v948_v32 = vadd.f32 %v708_v19, %v890_v43  ;;  %v622_v33 = vadd.f32 -1.0, %v753_v29  ;;  %v755_v34 = vpop.eup %754  ;;  %vm493_vm15 = vcmp.gt.f32.partialorder %v942_v23, 0.0 }
 0x1dc   :  { %567 = vst [vmem:[#allocation2 + $0x30] sm:$0xff] %v551_v30  ;;  %772 = vpow2.f32 %v521_v28  ;;  %v545_v35 = vsel %vm481_vm4, %v898_v53, %v618_v31  ;;  %v955_v37 = vadd.f32 %v890_v43, %v395_v25  ;;  %v757_v38 = vpop.eup %756  ;;  %v621_v40 = vadd.f32 -1.0, %v755_v34 }
 0x1dd   :  { %v527_v36 = vmul.f32 1.442695, %v948_v32  ;;  %561 = vst [vmem:[#allocation2] sm:$0xff] %v545_v35  ;;  %v549_v39 = vsel %vm485_vm5, %v901_v54, %v622_v33  ;;  %v759_v41 = vpop.eup %758  ;;  %v625_v42 = vadd.f32 -1.0, %v757_v38  ;;  %vm496_vm0 = vcmp.gt.f32.partialorder %v948_v32, 0.0 }
 0x1de   :  { %565 = vst [vmem:[#allocation2 + $0x20] sm:$0xff] %v549_v39  ;;  %v523_v44 = vmul.f32 1.442695, %v955_v37  ;;  %v761_v45 = vpop.eup %760  ;;  %v548_v46 = vsel %vm484_vm6, %v906_v60, %v621_v40  ;;  %v619_v43 = vadd.f32 -1.0, %v759_v41  ;;  %vm494_vm1 = vcmp.gt.f32.partialorder %v955_v37, 0.0 }
 0x1df   :  { %774 = vpow2.f32 %v527_v36  ;;  %v763_v47 = vpop.eup %762  ;;  %564 = vst [vmem:[#allocation2 + $0x18] sm:$0xff] %v548_v46  ;;  %v552_v48 = vsel %vm488_vm7, %v909_v61, %v625_v42  ;;  %v623_v49 = vadd.f32 -1.0, %v761_v45 }
 0x1e0   :  { %776 = vpow2.f32 %v523_v44  ;;  %568 = vst [vmem:[#allocation2 + $0x38] sm:$0xff] %v552_v48  ;;  %v546_v50 = vsel %vm482_vm8, %v912_v62, %v619_v43  ;;  %v628_v51 = vadd.f32 -1.0, %v763_v47 }
 0x1e1   :  { %v765_v52 = vpop.eup %764  ;;  %562 = vst [vmem:[#allocation2 + $0x8] sm:$0xff] %v546_v50  ;;  %v550_v53 = vsel %vm486_vm9, %v915_v63, %v623_v49 }
 0x1e2   :  { %566 = vst [vmem:[#allocation2 + $0x28] sm:$0xff] %v550_v53  ;;  %v555_v55 = vsel %vm491_vm10, %v922_v6, %v628_v51  ;;  %v626_v56 = vadd.f32 -1.0, %v765_v52 }
 0x1e3   :  { %v767_v54 = vpop.eup %766  ;;  %571 = vst [vmem:[#allocation2 + $0x50] sm:$0xff] %v555_v55 }
 0x1e4   :  { %v629_v57 = vadd.f32 -1.0, %v767_v54  ;;  %v553_v59 = vsel %vm489_vm11, %v926_v9, %v626_v56 }
 0x1e5   :  { %v769_v58 = vpop.eup %768  ;;  %569 = vst [vmem:[#allocation2 + $0x40] sm:$0xff] %v553_v59 }
 0x1e6   :  { %v556_v61 = vsel %vm492_vm12, %v929_v10, %v629_v57  ;;  %v627_v62 = vadd.f32 -1.0, %v769_v58 }
 0x1e7   :  { %v771_v60 = vpop.eup %770  ;;  %572 = vst [vmem:[#allocation2 + $0x58] sm:$0xff] %v556_v61 }
 0x1e8   :  { %v632_v63 = vadd.f32 -1.0, %v771_v60  ;;  %v554_v1 = vsel %vm490_vm13, %v934_v14, %v627_v62 }
 0x1e9   :  { %v773_v0 = vpop.eup %772  ;;  %570 = vst [vmem:[#allocation2 + $0x48] sm:$0xff] %v554_v1 }
 0x1ea   :  { %v559_v2 = vsel %vm495_vm14, %v937_v16, %v632_v63  ;;  %v630_v3 = vadd.f32 -1.0, %v773_v0 }
 0x1eb   :  { %575 = vst [vmem:[#allocation2 + $0x70] sm:$0xff] %v559_v2 }
 0x1ec   :  { %v775_v4 = vpop.eup %774  ;;  %v557_v5 = vsel %vm493_vm15, %v942_v23, %v630_v3 }
 0x1ed   :  { %573 = vst [vmem:[#allocation2 + $0x60] sm:$0xff] %v557_v5  ;;  %v633_v6 = vadd.f32 -1.0, %v775_v4  ;;  %v777_v7 = vpop.eup %776 }
 0x1ee   :  { %v631_v9 = vadd.f32 -1.0, %v777_v7 }
 0x1ef   :  { %v560_v8 = vsel %vm496_vm0, %v948_v32, %v633_v6 }
 0x1f0   :  { %576 = vst [vmem:[#allocation2 + $0x78] sm:$0xff] %v560_v8  ;;  %v558_v10 = vsel %vm494_vm1, %v955_v37, %v631_v9 }
 0x1f1   :  { %574 = vst [vmem:[#allocation2 + $0x68] sm:$0xff] %v558_v10 }
 0x1f2   :  { %789 = shalt.err (!%p786_p4)
}
 0x1f3   :  { %s801_s23 = smov 128   ;;  %s802_s24 = smov 8  }
 0x1f4   :  { %588 = dma.vmem_to_hbm [thread:$0]  %s583_s3, 2048, %s990_s4, [#allocation3], %s801_s23, %s801_s23, %s802_s24  }
 0x1f5   :  { %798 = dma.done.wait [#allocation3], 2048  }
 0x1f6   :  { %799 = vsyncadd [#allocation3], 4294965248 }
 0x1f7   :  { %592 = vsyncpa [#allocation3], 1 }

</bundles_post_ra>
